<compile_context>
chip_gen: v7x
topology: tpu7x:2x2x1
jax: 0.10.0
libtpu: 0.0.40
codegen_flags: <defaults>
</compile_context>

<pallas_src>
import jax
import jax.numpy as jnp
from jax.experimental import pallas as pl
from jax.experimental.pallas import tpu as pltpu

_LANES = 128
_SUBLANES = 8


def _cdiv(a, b):
    return -(-a // b)


def _round_up(a, b):
    return _cdiv(a, b) * b


def _make_kernel(rows, tile_rows, num_tiles, inv_b, ragged):
    """Builds the kernel with all static config (rows, tiling, 1/B) baked in."""
    last = num_tiles - 1

    def kernel(alpha_ref, ent_ref, crit_ref, out_ref, ent_acc, crit_acc):
        # alpha_ref: SMEM (1,) f32 scalar-prefetch (alpha may be a traced value)
        # ent_ref/crit_ref: VMEM (tile_rows, 128) native dtype
        # out_ref:  SMEM (1, 1) f32 scalar loss
        # ent_acc/crit_acc: VMEM (8, 128) f32 per-lane partial sums
        t = pl.program_id(0)

        @pl.when(t == 0)
        def _init():
            ent_acc[...] = jnp.zeros_like(ent_acc)
            crit_acc[...] = jnp.zeros_like(crit_acc)

        def accumulate(mask_tail):
            ent = ent_ref[...].astype(jnp.float32)     # cast in-kernel (VPU, hidden)
            crit = crit_ref[...].astype(jnp.float32)
            if mask_tail:
                # Mask keyed off the GLOBAL row index: rows >= `rows` were never
                # DMA'd (unspecified VMEM contents) and must not be accumulated.
                row = t * tile_rows + jax.lax.broadcasted_iota(
                    jnp.int32, (tile_rows, _LANES), 0)
                keep = row < rows
                ent = jnp.where(keep, ent, 0.0)
                crit = jnp.where(keep, crit, 0.0)
            # Fold sublane groups of 8 rows onto the (8,128) accumulators:
            # pure vreg adds, fully hidden under the tile DMA.
            ent_acc[...] += ent.reshape(-1, _SUBLANES, _LANES).sum(axis=0)
            crit_acc[...] += crit.reshape(-1, _SUBLANES, _LANES).sum(axis=0)

        if ragged:
            # Only the edge tile pays for the mask; bulk tiles are plain adds.
            @pl.when(t < last)
            def _bulk():
                accumulate(False)

            @pl.when(t == last)
            def _edge():
                accumulate(True)
        else:
            accumulate(False)

        @pl.when(t == last)
        def _finalize():
            # Full cross-sublane/cross-lane reduce + alpha + 1/B in-kernel
            # (XLU/VPU slots are free in this DMA-bound kernel); single scalar
            # result goes to SMEM -> no separate XLA reduction afterwards.
            alpha = alpha_ref[0]
            loss = (alpha * jnp.sum(ent_acc[...])
                    - jnp.sum(crit_acc[...])) * inv_b
            out_ref[0, 0] = loss

    return kernel


def sac_policy_loss(min_critic, entropy, alpha, *,
                    block_bytes=2 * 1024 * 1024, tile_rows=None):
    """loss = mean(alpha * entropy - min_critic).  Accepts any batch size."""
    assert min_critic.shape == entropy.shape
    b = int(min_critic.size)
    assert b > 0

    ent = entropy.reshape(-1)
    crit = min_critic.reshape(-1)

    # Lane-dense (rows, 128) view.  Zero-copy reshape when B % 128 == 0;
    # otherwise pad by at most 127 zeros (zeros contribute 0 to both sums and
    # the mean divides by the real B).
    rem = b % _LANES
    if rem:
        pad = _LANES - rem
        ent = jnp.pad(ent, (0, pad))
        crit = jnp.pad(crit, (0, pad))
        rows = (b + pad) // _LANES
    else:
        rows = b // _LANES
    ent2d = ent.reshape(rows, _LANES)
    crit2d = crit.reshape(rows, _LANES)

    # Tile size: target ~block_bytes per input block (scaled by dtype so
    # bytes/step stay constant), multiple of 8 sublanes, clamped for small B.
    if tile_rows is None:
        itemsize = max(ent2d.dtype.itemsize, crit2d.dtype.itemsize)
        tile_rows = max(_SUBLANES, block_bytes // (_LANES * itemsize))
    tile_rows = _round_up(min(int(tile_rows), _round_up(rows, _SUBLANES)),
                          _SUBLANES)
    num_tiles = _cdiv(rows, tile_rows)
    ragged = (rows % tile_rows) != 0   # edge tile partially out of bounds

    alpha_arr = jnp.asarray(alpha, dtype=jnp.float32).reshape(1)
    kernel = _make_kernel(rows, tile_rows, num_tiles, 1.0 / b, ragged)

    data_spec = pl.BlockSpec((tile_rows, _LANES), lambda t, _alpha: (t, 0))

    out = pl.pallas_call(
        kernel,
        out_shape=jax.ShapeDtypeStruct((1, 1), jnp.float32),
        grid_spec=pltpu.PrefetchScalarGridSpec(
            num_scalar_prefetch=1,
            grid=(num_tiles,),
            in_specs=[data_spec, data_spec],        # entropy, min_critic
            out_specs=pl.BlockSpec(memory_space=pltpu.MemorySpace.SMEM),
            scratch_shapes=[
                pltpu.VMEM((_SUBLANES, _LANES), jnp.float32),
                pltpu.VMEM((_SUBLANES, _LANES), jnp.float32),
            ],
        ),
        compiler_params=pltpu.CompilerParams(
            dimension_semantics=("arbitrary",),
            vmem_limit_bytes=32 * 1024 * 1024,
        ),
    )(alpha_arr, ent2d, crit2d)

    return out[0, 0]


if __name__ == "__main__":
    key = jax.random.PRNGKey(0)
    k1, k2 = jax.random.split(key)
    alpha = jnp.float32(0.2)

    # Case 1: small batch, not a multiple of 128 (exercises the <=127 pad path).
    B = 1000
    min_critic = jax.random.normal(k1, (B,), dtype=jnp.float32)
    entropy = jax.random.normal(k2, (B,), dtype=jnp.float32)
    loss = sac_policy_loss(min_critic, entropy, alpha)
    jax.block_until_ready(loss)
    ref = jnp.mean(alpha * entropy - min_critic)
    assert jnp.allclose(loss, ref, atol=1e-5, rtol=1e-5), (loss, ref)

    # Case 2: B = 23 * 128 with a forced small tile -> ragged edge tile,
    # exercises the in-kernel global-row-index masking path.
    B2 = 2944
    mc2 = jax.random.normal(k1, (B2,), dtype=jnp.float32)
    en2 = jax.random.normal(k2, (B2,), dtype=jnp.float32)
    loss2 = sac_policy_loss(mc2, en2, alpha, tile_rows=16)
    jax.block_until_ready(loss2)
    ref2 = jnp.mean(alpha * en2 - mc2)
    assert jnp.allclose(loss2, ref2, atol=1e-5, rtol=1e-5), (loss2, ref2)

    print("KERNEL_OK")
</pallas_src>

<mosaic_0001>
module attributes {stable_mosaic.version = 11 : i64} {
  func.func @kernel(%arg0: i32, %arg1: memref<1xf32, #tpu.memory_space<smem>>, %arg2: memref<8x128xf32, #tpu.memory_space<vmem>>, %arg3: memref<8x128xf32, #tpu.memory_space<vmem>>, %arg4: memref<1x1xf32, #tpu.memory_space<smem>>, %arg5: memref<8x128xf32, #tpu.memory_space<vmem>>, %arg6: memref<8x128xf32, #tpu.memory_space<vmem>>) attributes {dimension_semantics = [#tpu.dimension_semantics<arbitrary>], iteration_bounds = array<i64: 1>, scalar_prefetch = 1 : i64, scratch_operands = 2 : i64, tpu.core_type = #tpu.core_type<tc>, window_params = [{transform_indices = @transform_0, window_bounds = array<i64: 8, 128>}, {transform_indices = @transform_1, window_bounds = array<i64: 8, 128>}, {transform_indices = @transform_2, window_bounds = array<i64: 1, 1>}]} {
    %c0_i32 = arith.constant 0 : i32
    %0 = arith.cmpi eq, %arg0, %c0_i32 : i32
    %1 = arith.extui %0 : i1 to i32
    %c0_i32_0 = arith.constant 0 : i32
    %2 = arith.cmpi ne, %1, %c0_i32_0 : i32
    scf.if %2 {
      %cst_15 = arith.constant 0.000000e+00 : f32
      %18 = vector.broadcast %cst_15 : f32 to vector<8x128xf32>
      %c0_16 = arith.constant 0 : index
      %c0_17 = arith.constant 0 : index
      %19 = vector.load %arg5[%c0_16, %c0_17] : memref<8x128xf32, #tpu.memory_space<vmem>>, vector<8x128xf32>
      tpu.vector_store %arg5[%c0_16, %c0_17], %18 {strides = array<i32>} : memref<8x128xf32, #tpu.memory_space<vmem>>, vector<8x128xf32>,
      %cst_18 = arith.constant 0.000000e+00 : f32
      %20 = vector.broadcast %cst_18 : f32 to vector<8x128xf32>
      %c0_19 = arith.constant 0 : index
      %c0_20 = arith.constant 0 : index
      %21 = vector.load %arg6[%c0_19, %c0_20] : memref<8x128xf32, #tpu.memory_space<vmem>>, vector<8x128xf32>
      tpu.vector_store %arg6[%c0_19, %c0_20], %20 {strides = array<i32>} : memref<8x128xf32, #tpu.memory_space<vmem>>, vector<8x128xf32>,
    } else {
    }
    %c0 = arith.constant 0 : index
    %c0_1 = arith.constant 0 : index
    %3 = vector.load %arg2[%c0, %c0_1] : memref<8x128xf32, #tpu.memory_space<vmem>>, vector<8x128xf32>
    %c0_2 = arith.constant 0 : index
    %c0_3 = arith.constant 0 : index
    %4 = vector.load %arg3[%c0_2, %c0_3] : memref<8x128xf32, #tpu.memory_space<vmem>>, vector<8x128xf32>
    %c0_4 = arith.constant 0 : index
    %c0_5 = arith.constant 0 : index
    %5 = vector.load %arg5[%c0_4, %c0_5] : memref<8x128xf32, #tpu.memory_space<vmem>>, vector<8x128xf32>
    %6 = vector.shape_cast %3 : vector<8x128xf32> to vector<1x8x128xf32>
    %cst = arith.constant dense<0.000000e+00> : vector<8x128xf32>
    %7 = vector.multi_reduction <add>, %6, %cst [0] : vector<1x8x128xf32> to vector<8x128xf32>
    %8 = arith.addf %5, %7 : vector<8x128xf32>
    %c0_6 = arith.constant 0 : index
    %c0_7 = arith.constant 0 : index
    %9 = vector.load %arg5[%c0_6, %c0_7] : memref<8x128xf32, #tpu.memory_space<vmem>>, vector<8x128xf32>
    tpu.vector_store %arg5[%c0_6, %c0_7], %8 {strides = array<i32>} : memref<8x128xf32, #tpu.memory_space<vmem>>, vector<8x128xf32>,
    %c0_8 = arith.constant 0 : index
    %c0_9 = arith.constant 0 : index
    %10 = vector.load %arg6[%c0_8, %c0_9] : memref<8x128xf32, #tpu.memory_space<vmem>>, vector<8x128xf32>
    %11 = vector.shape_cast %4 : vector<8x128xf32> to vector<1x8x128xf32>
    %cst_10 = arith.constant dense<0.000000e+00> : vector<8x128xf32>
    %12 = vector.multi_reduction <add>, %11, %cst_10 [0] : vector<1x8x128xf32> to vector<8x128xf32>
    %13 = arith.addf %10, %12 : vector<8x128xf32>
    %c0_11 = arith.constant 0 : index
    %c0_12 = arith.constant 0 : index
    %14 = vector.load %arg6[%c0_11, %c0_12] : memref<8x128xf32, #tpu.memory_space<vmem>>, vector<8x128xf32>
    tpu.vector_store %arg6[%c0_11, %c0_12], %13 {strides = array<i32>} : memref<8x128xf32, #tpu.memory_space<vmem>>, vector<8x128xf32>,
    %c0_i32_13 = arith.constant 0 : i32
    %15 = arith.cmpi eq, %arg0, %c0_i32_13 : i32
    %16 = arith.extui %15 : i1 to i32
    %c0_i32_14 = arith.constant 0 : i32
    %17 = arith.cmpi ne, %16, %c0_i32_14 : i32
    scf.if %17 {
      %c0_15 = arith.constant 0 : index
      %18 = memref.load %arg1[%c0_15] : memref<1xf32, #tpu.memory_space<smem>>
      %c0_16 = arith.constant 0 : index
      %c0_17 = arith.constant 0 : index
      %19 = vector.load %arg5[%c0_16, %c0_17] : memref<8x128xf32, #tpu.memory_space<vmem>>, vector<8x128xf32>
      %20 = vector.shape_cast %19 : vector<8x128xf32> to vector<1x8x128xf32>
      %cst_18 = arith.constant dense<0.000000e+00> : vector<1xf32>
      %21 = vector.multi_reduction <add>, %20, %cst_18 [1, 2] : vector<1x8x128xf32> to vector<1xf32>
      %22 = vector.shape_cast %21 : vector<1xf32> to vector<1x1x1xf32>
      %23 = vector.extract %22[0, 0, 0] : f32 from vector<1x1x1xf32>
      %24 = arith.mulf %18, %23 : f32
      %c0_19 = arith.constant 0 : index
      %c0_20 = arith.constant 0 : index
      %25 = vector.load %arg6[%c0_19, %c0_20] : memref<8x128xf32, #tpu.memory_space<vmem>>, vector<8x128xf32>
      %26 = vector.shape_cast %25 : vector<8x128xf32> to vector<1x8x128xf32>
      %cst_21 = arith.constant dense<0.000000e+00> : vector<1xf32>
      %27 = vector.multi_reduction <add>, %26, %cst_21 [1, 2] : vector<1x8x128xf32> to vector<1xf32>
      %28 = vector.shape_cast %27 : vector<1xf32> to vector<1x1x1xf32>
      %29 = vector.extract %28[0, 0, 0] : f32 from vector<1x1x1xf32>
      %30 = arith.subf %24, %29 : f32
      %cst_22 = arith.constant 1.000000e-03 : f32
      %31 = arith.mulf %30, %cst_22 : f32
      %c0_23 = arith.constant 0 : index
      %c0_24 = arith.constant 0 : index
      %32 = memref.load %arg4[%c0_23, %c0_24] : memref<1x1xf32, #tpu.memory_space<smem>>
      memref.store %31, %arg4[%c0_23, %c0_24] : memref<1x1xf32, #tpu.memory_space<smem>>
    } else {
    }
    return
  }
  func.func @transform_0(%arg0: i32, %arg1: memref<1xf32, #tpu.memory_space<smem>>) -> (i32, i32) {
    %c0_i32 = arith.constant 0 : i32
    %c0_i32_0 = arith.constant 0 : i32
    return %arg0, %c0_i32 : i32, i32
  }
  func.func @transform_1(%arg0: i32, %arg1: memref<1xf32, #tpu.memory_space<smem>>) -> (i32, i32) {
    %c0_i32 = arith.constant 0 : i32
    %c0_i32_0 = arith.constant 0 : i32
    return %arg0, %c0_i32 : i32, i32
  }
  func.func @transform_2(%arg0: i32, %arg1: memref<1xf32, #tpu.memory_space<smem>>) -> (i32, i32) {
    %c0_i32 = arith.constant 0 : i32
    %c0_i32_0 = arith.constant 0 : i32
    %c0_i32_1 = arith.constant 0 : i32
    return %c0_i32, %c0_i32_0 : i32, i32
  }
}

</mosaic_0001>

<bundles_post_ra>
// kernel: tpu_custom_call.1
= control target key start
LH: loop header
LB: loop body
LE: loop exit
PB: predicated region body
PF: predicated region fallthrough
CT: control target
= control target key end

     0   :  { %9 = vsyncpa [#allocation7], 0  ;;  %s227_s0 = inlined_call_operand.<no memory space> [shape: f32[1], index: 0, kind: input, shape index: {}]   ;;  %s228_s1 = inlined_call_operand.hbm [shape: f32[8,128], index: 1, kind: input, shape index: {}]   ;;  %s229_s2 = inlined_call_operand.hbm [shape: f32[8,128], index: 2, kind: input, shape index: {}]   ;;  %s230_s3 = inlined_call_operand.hbm [shape: f32[1,1], index: 3, kind: output, shape index: {}]  }
   0x1   :  { %10 = vsyncpa [#allocation10], 0 }
   0x2   :  { %11 = vsyncpa [#allocation8], 0  ;;  %s165_s12 = smov [#allocation6]   ;;  %s166_s14 = smov [#allocation9]  }
   0x3   :  { %s18_s13 = sshll.u32 %s165_s12, 4  ;;  %s28_s15 = sshll.u32 %s166_s14, 4  ;;  %s19_s13 = int_to_ptr.vmem [resolvable:$true] %s18_s13  ;;  %s29_s15 = int_to_ptr.vmem [resolvable:$true] %s28_s15 }
   0x4   :  { %s105_s18 = scalar_lea.hbm %s228_s1, 128 }
   0x5   :  { %p106_p0 = scmp.ne.s32.totalorder %s228_s1, %s105_s18  ;;  %p109_p1 = scmp.lt.u32.totalorder %s105_s18, %s228_s1 }
   0x7   :  { %p111_p2 = pnand %p109_p1, %p106_p0 }
   0x9   :  { %114 = shalt.err (!%p111_p2)
}
   0xa   :  { %s115_s23 = scalar_lea.vmem %s19_s13, 128  ;;  %p120_p4 = scmp.lt.s32.totalorder %s19_s13, %s19_s13 }
   0xb   :  { %p116_p3 = scmp.ne.s32.totalorder %s19_s13, %s115_s23  ;;  %p121_p5 = scmp.lt.s32.totalorder %s115_s23, %s115_s23 }
   0xd   :  { %p122_p6 = por %p121_p5, %p120_p4 }
   0xf   :  { %p123_p7 = pnand %p122_p6, %p116_p3 }
  0x11   :  { %126 = shalt.err (!%p123_p7)
}
  0x12   :  { %21 = dma.hbm_to_vmem [thread:$0]  %s228_s1, 128, %s19_s13, [#allocation7]  }
  0x13   :  { %s127_s28 = scalar_lea.hbm %s229_s2, 128 }
  0x14   :  { %p128_p8 = scmp.ne.s32.totalorder %s229_s2, %s127_s28  ;;  %p131_p9 = scmp.lt.u32.totalorder %s127_s28, %s229_s2 }
  0x16   :  { %p133_p10 = pnand %p131_p9, %p128_p8 }
  0x18   :  { %136 = shalt.err (!%p133_p10)
}
  0x19   :  { %s137_s6 = scalar_lea.vmem %s29_s15, 128  ;;  %p142_p12 = scmp.lt.s32.totalorder %s29_s15, %s29_s15 }
  0x1a   :  { %p138_p11 = scmp.ne.s32.totalorder %s29_s15, %s137_s6  ;;  %p143_p13 = scmp.lt.s32.totalorder %s137_s6, %s137_s6 }
  0x1c   :  { %p144_p0 = por %p143_p13, %p142_p12 }
  0x1e   :  { %p145_p1 = pnand %p144_p0, %p138_p11 }
  0x20   :  { %148 = shalt.err (!%p145_p1)
}
  0x21   :  { %31 = dma.hbm_to_vmem [thread:$0]  %s229_s2, 128, %s29_s15, [#allocation10]  }
  0x22   :  { %159 = dma.done.wait [#allocation7], 128  }
  0x23   :  { %160 = vsyncadd [#allocation7], 4294967168 }
  0x24   :  { %161 = dma.done.wait [#allocation10], 128  }
  0x25   :  { %162 = vsyncadd [#allocation10], 4294967168  ;;  %v44_v0 = vld [vmem:[#allocation6] sm:$0xff]  ;;  %v45_v1 = vld [vmem:[#allocation9] sm:$0xff]  ;;  %s149_s16 = scalar_lea.hbm %s230_s3, 16 }
  0x26   :  { %59 = vadd.xlane.f32.xlu0 %v44_v0  ;;  %p150_p2 = scmp.ne.s32.totalorder %s230_s3, %s149_s16  ;;  %p153_p3 = scmp.lt.u32.totalorder %s149_s16, %s230_s3 }
  0x28   :  { %p155_p4 = pnand %p153_p3, %p150_p2 }
  0x2a   :  { %70 = vadd.xlane.f32.xlu0 %v45_v1 }
  0xb3   :  { %v60_v2 = vpop.xlane.xlu0 %59 }
  0xb4   :  { %v61_v3 = vrot.slane %v60_v2, 4 }
  0xb6   :  { %v62_v4 = vadd.f32 %v61_v3, %v60_v2 }
  0xb7   :  { %v71_v5 = vpop.xlane.xlu0 %70 }
  0xb8   :  { %v63_v6 = vrot.slane %v62_v4, 2  ;;  %v72_v7 = vrot.slane %v71_v5, 4 }
  0xba   :  { %v73_v8 = vadd.f32 %v72_v7, %v71_v5  ;;  %v64_v9 = vadd.f32 %v63_v6, %v62_v4 }
  0xbc   :  { %v74_v10 = vrot.slane %v73_v8, 2  ;;  %v65_v11 = vrot.slane %v64_v9, 1 }
  0xbe   :  { %v75_v12 = vadd.f32 %v74_v10, %v73_v8  ;;  %v66_v13 = vadd.f32 %v65_v11, %v64_v9 }
  0xc0   :  { %98 = vpush %v66_v13  ;;  %v76_v14 = vrot.slane %v75_v12, 1 }
  0xc2   :  { %v77_v15 = vadd.f32 %v76_v14, %v75_v12 }
  0xc4   :  { %100 = vpush %v77_v15 }
  0xf1   :  { %s99_s2 = spop %98 }
  0xf2   :  { %s68_s10 = smul.f32 %s99_s2, %s227_s0 }
  0xf5   :  { %s101_s11 = spop %100 }
  0xf6   :  { %s79_s12 = ssub.f32 %s68_s10, %s101_s11 }
  0xf8   :  { %s80_s13 = smul.f32 0.001, %s79_s12 }
  0xfa   :  { %82 = sst [smem:[#allocation11]] %s80_s13 }
  0xfb   :  { %158 = shalt.err (!%p155_p4)
}
  0xfc   :  { %s167_s21 = smov [#allocation11]  }
  0xfd   :  { %90 = dma.smem_to_hbm %s167_s21, 16, %s230_s3, [#allocation8]  }
  0xfe   :  { %163 = dma.done.wait [#allocation8], 16  }
  0xff   :  { %164 = vsyncadd [#allocation8], 4294967280 }
 0x100   :  { %94 = sfence }
 0x101   :  { %95 = vsyncpa [#allocation7], 1 }
 0x102   :  { %96 = vsyncpa [#allocation10], 1 }
 0x103   :  { %97 = vsyncpa [#allocation8], 1 }

</bundles_post_ra>
